<compile_context>
chip_gen: v7x
topology: tpu7x:2x2x1
jax: 0.10.0
libtpu: 0.0.40
codegen_flags: <defaults>
</compile_context>

<pallas_src>
import functools

import jax
import jax.numpy as jnp
from jax.experimental import pallas as pl
from jax.experimental.pallas import tpu as pltpu


def _round_up(a, b):
    return (a + b - 1) // b * b


def _vmem_capacity_bytes():
    try:
        return int(pltpu.get_tpu_info().vmem_capacity_bytes)
    except Exception:
        return 64 * 1024 * 1024  # conservative fallback (v7x per-TC VMEM)


def _channel_attention_kernel(x_ref, w1t_ref, b1_ref, w2t_ref, b2_ref,
                              o_ref, sum_acc, max_acc,
                              *, inv_hw, last_sp_valid, sp_ragged):
    # x_ref:   (n_tile, C, hw_tile) native dtype (ragged tiles are masked DMAs).
    # w1t_ref: (C, M) f32   b1_ref: (1, M) f32  (bias pre-doubled)
    # w2t_ref: (M, C) f32   b2_ref: (1, C) f32  (bias pre-doubled)
    # o_ref:   (1, n_tile, C) output block, resident across the spatial axis.
    # sum_acc / max_acc: (n_tile, C) f32 running spatial sum / max.
    hw_idx = pl.program_id(1)
    n_hw = pl.num_programs(1)

    @pl.when(hw_idx == 0)
    def _init():
        sum_acc[...] = jnp.zeros_like(sum_acc)
        max_acc[...] = jnp.full_like(max_acc, -jnp.inf)

    x = x_ref[...].astype(jnp.float32)          # upcast in-vreg, accumulate f32

    def _accum(x_for_sum, x_for_max):
        sum_acc[...] += jnp.sum(x_for_sum, axis=-1)                  # (n_tile, C)
        max_acc[...] = jnp.maximum(max_acc[...], jnp.max(x_for_max, axis=-1))

    if sp_ragged:
        # Interior spatial tiles: plain reduce, no mask cost (stays DMA-bound).
        @pl.when(hw_idx < n_hw - 1)
        def _interior():
            _accum(x, x)

        # Only the last spatial tile pays for iota + where; out-of-range lanes
        # are garbage (no zero-padding anymore) so BOTH sum and max are masked.
        @pl.when(hw_idx == n_hw - 1)
        def _last():
            lane = jax.lax.broadcasted_iota(jnp.int32, x.shape, 2)
            valid = lane < last_sp_valid
            _accum(jnp.where(valid, x, 0.0), jnp.where(valid, x, -jnp.inf))
    else:
        _accum(x, x)

    @pl.when(hw_idx == n_hw - 1)
    def _finalize():
        # Fused branches (no activation between the two 1x1 convs):
        #   convs(avg) + convs(max) = ((avg + max) W1^T + 2 b1) W2^T + 2 b2
        f = sum_acc[...] * inv_hw + max_acc[...]                     # (n_tile, C)
        h = jnp.dot(f, w1t_ref[...], preferred_element_type=jnp.float32) + b1_ref[...]
        y = jnp.dot(h, w2t_ref[...], preferred_element_type=jnp.float32) + b2_ref[...]
        o_ref[0] = jax.nn.sigmoid(y).astype(o_ref.dtype)


def channel_attention_block(x_nchw, w1, b1, w2, b2,
                            *, hw_tile_max=None, tile_bytes_budget=None):
    """x_nchw: (N, C, H, W); w1: (M, C, 1, 1); b1: (M,); w2: (C, M, 1, 1); b2: (C,).
    Returns (N, C, 1, 1), matching the PyTorch forward."""
    N, C, H, W = x_nchw.shape
    M = w1.shape[0]
    HW = H * W
    itemsize = jnp.dtype(x_nchw.dtype).itemsize

    vmem_cap = _vmem_capacity_bytes()
    if tile_bytes_budget is None:
        # Bigger tiles on 128 MiB-VMEM parts (v5e/v6e), tighter on v7x (64 MiB).
        tile_bytes_budget = (16 << 20) if vmem_cap >= (96 << 20) else (10 << 20)

    # ---- tile selection -----------------------------------------------------
    # Batch tile: cap at 8 rows, but keep the "parallel" grid axis >= 2 when
    # N >= 2 so both v7x TensorCores get work.  No batch padding is streamed.
    n_tile = min(8, max(1, pl.cdiv(N, 2)))
    grid_n = pl.cdiv(N, n_tile)

    # Spatial tile: pick the number of spatial tiles first, then round the
    # tile up to a 128-lane multiple (per-row slack < 128 lanes; the ragged
    # DMA never streams the slack anyway).
    row_bytes = n_tile * C * itemsize
    hw_cap = max(128, (tile_bytes_budget // row_bytes) // 128 * 128)
    if hw_tile_max is not None:
        hw_cap = max(128, min(hw_cap, (hw_tile_max // 128) * 128))
    n_sp = pl.cdiv(HW, hw_cap)
    hw_tile = min(_round_up(pl.cdiv(HW, n_sp), 128), _round_up(HW, 128))
    grid_sp = pl.cdiv(HW, hw_tile)
    sp_ragged = (grid_sp * hw_tile) != HW
    last_sp_valid = HW - (grid_sp - 1) * hw_tile

    # ---- operand prep: NO materialized padding, stream x in native dtype ----
    x_flat = x_nchw.reshape(N, C, HW)

    # 1x1 convs on (., C, 1, 1) are matmuls over channels; pre-transpose the
    # weights and pre-double the biases for the fused two-branch MLP.
    w1t = w1.reshape(M, C).T.astype(jnp.float32)          # (C, M)
    w2t = w2.reshape(C, M).T.astype(jnp.float32)          # (M, C)
    b1x2 = (2.0 * b1).reshape(1, M).astype(jnp.float32)
    b2x2 = (2.0 * b2).reshape(1, C).astype(jnp.float32)

    kernel = functools.partial(
        _channel_attention_kernel,
        inv_hw=1.0 / HW,
        last_sp_valid=int(last_sp_valid),
        sp_ragged=bool(sp_ragged))

    # ---- VMEM budget: 2x input tile (double-buffer) + params + acc + out ----
    tile_bytes = n_tile * C * hw_tile * itemsize
    param_bytes = (2 * C * M + M + C) * 4
    acc_bytes = 2 * n_tile * C * 4
    out_bytes = 2 * n_tile * C * itemsize
    vmem_limit = 2 * tile_bytes + 2 * param_bytes + acc_bytes + out_bytes + (4 << 20)
    vmem_limit = int(max(16 << 20, min(vmem_limit, (vmem_cap * 3) // 4)))

    cost = pl.CostEstimate(
        flops=int(2 * N * C * HW + 4 * N * C * M),
        transcendentals=int(N * C),
        bytes_accessed=int(N * C * HW * itemsize + N * C * itemsize + param_bytes))

    # TODO(synk): optional v7x/bf16 micro-opt (spatial sum via a dot against a
    # ones column on the otherwise-idle MXU) is left out; f32 path is DMA-bound.
    out = pl.pallas_call(
        kernel,
        out_shape=jax.ShapeDtypeStruct((grid_n, n_tile, C), x_nchw.dtype),
        grid_spec=pltpu.PrefetchScalarGridSpec(
            num_scalar_prefetch=0,
            grid=(grid_n, grid_sp),
            in_specs=[
                pl.BlockSpec((n_tile, C, hw_tile), lambda i, j: (i, 0, j)),
                pl.BlockSpec((C, M), lambda i, j: (0, 0)),
                pl.BlockSpec((1, M), lambda i, j: (0, 0)),
                pl.BlockSpec((M, C), lambda i, j: (0, 0)),
                pl.BlockSpec((1, C), lambda i, j: (0, 0)),
            ],
            out_specs=pl.BlockSpec((1, n_tile, C), lambda i, j: (i, 0, 0)),
            scratch_shapes=[pltpu.VMEM((n_tile, C), jnp.float32),   # running sum
                            pltpu.VMEM((n_tile, C), jnp.float32)],  # running max
        ),
        compiler_params=pltpu.CompilerParams(
            dimension_semantics=("parallel", "arbitrary"),
            vmem_limit_bytes=vmem_limit),
        cost_estimate=cost,
    )(x_flat, w1t, b1x2, w2t, b2x2)

    # Padded rows (batch-ragged last tile) are sliced off here.
    return out.reshape(grid_n * n_tile, C)[:N].reshape(N, C, 1, 1)


def _reference(x_nchw, w1, b1, w2, b2):
    # Pure-JAX reference mirroring the PyTorch semantics.
    N, C, H, W = x_nchw.shape
    M = w1.shape[0]
    f_avg = jnp.mean(x_nchw, axis=(2, 3))          # (N, C)
    f_max = jnp.max(x_nchw, axis=(2, 3))           # (N, C)
    W1 = w1.reshape(M, C)
    W2 = w2.reshape(C, M)

    def mlp(v):
        return (v @ W1.T + b1) @ W2.T + b2

    y = jax.nn.sigmoid(mlp(f_avg) + mlp(f_max))
    return y.reshape(N, C, 1, 1)


if __name__ == "__main__":
    key = jax.random.PRNGKey(0)
    kx, k1, k2, k3, k4 = jax.random.split(key, 5)

    N, C, M, Hs, Ws = 2, 4, 2, 16, 16
    x = jax.random.normal(kx, (N, C, Hs, Ws), dtype=jnp.float32)

    # Shapes follow nn.Conv2d(C, M, 1) / nn.Conv2d(M, C, 1).
    w1 = jax.random.normal(k1, (M, C, 1, 1), dtype=jnp.float32) * 0.2
    b1 = jax.random.normal(k2, (M,), dtype=jnp.float32) * 0.1
    w2 = jax.random.normal(k3, (C, M, 1, 1), dtype=jnp.float32) * 0.2
    b2 = jax.random.normal(k4, (C,), dtype=jnp.float32) * 0.1

    # Case 1: aligned shapes, single spatial tile.
    out = channel_attention_block(x, w1, b1, w2, b2)
    out = jax.block_until_ready(out)
    ref = _reference(x, w1, b1, w2, b2)
    assert out.shape == (N, C, 1, 1)
    assert jnp.allclose(out, ref, atol=1e-5, rtol=1e-5)

    # Case 2: ragged batch tile + multi-step spatial reduction + ragged
    # (masked) last spatial tile.
    x2 = jax.random.normal(kx, (3, C, 9, 15), dtype=jnp.float32)
    out2 = jax.block_until_ready(
        channel_attention_block(x2, w1, b1, w2, b2, hw_tile_max=128))
    ref2 = _reference(x2, w1, b1, w2, b2)
    assert jnp.allclose(out2, ref2, atol=1e-5, rtol=1e-5)

    # Case 3: multi-step spatial reduction with exact tiling (no mask path).
    out3 = jax.block_until_ready(
        channel_attention_block(x, w1, b1, w2, b2, hw_tile_max=128))
    assert jnp.allclose(out3, ref, atol=1e-5, rtol=1e-5)

    print("KERNEL_OK")
</pallas_src>

<mosaic_0001>
module attributes {stable_mosaic.version = 11 : i64} {
  func.func @_channel_attention_kernel(%arg0: i32, %arg1: i32, %arg2: memref<1x4x256xf32, #tpu.memory_space<vmem>>, %arg3: memref<4x2xf32, #tpu.memory_space<vmem>>, %arg4: memref<1x2xf32, #tpu.memory_space<vmem>>, %arg5: memref<2x4xf32, #tpu.memory_space<vmem>>, %arg6: memref<1x4xf32, #tpu.memory_space<vmem>>, %arg7: memref<1x1x4xf32, #tpu.memory_space<vmem>>, %arg8: memref<1x4xf32, #tpu.memory_space<vmem>>, %arg9: memref<1x4xf32, #tpu.memory_space<vmem>>) attributes {dimension_semantics = [#tpu.dimension_semantics<parallel>, #tpu.dimension_semantics<arbitrary>], iteration_bounds = array<i64: 2, 1>, scalar_prefetch = 0 : i64, scratch_operands = 2 : i64, tpu.core_type = #tpu.core_type<tc>, window_params = [{transform_indices = @transform_0, window_bounds = array<i64: 1, 4, 256>}, {pipeline_mode = #tpu.pipeline_mode<synchronous>, transform_indices = @transform_1, window_bounds = array<i64: 4, 2>}, {pipeline_mode = #tpu.pipeline_mode<synchronous>, transform_indices = @transform_2, window_bounds = array<i64: 1, 2>}, {pipeline_mode = #tpu.pipeline_mode<synchronous>, transform_indices = @transform_3, window_bounds = array<i64: 2, 4>}, {pipeline_mode = #tpu.pipeline_mode<synchronous>, transform_indices = @transform_4, window_bounds = array<i64: 1, 4>}, {transform_indices = @transform_5, window_bounds = array<i64: 1, 1, 4>}]} {
    %c0_i32 = arith.constant 0 : i32
    %0 = arith.cmpi eq, %arg1, %c0_i32 : i32
    %1 = arith.extui %0 : i1 to i32
    %c0_i32_0 = arith.constant 0 : i32
    %2 = arith.cmpi ne, %1, %c0_i32_0 : i32
    scf.if %2 {
      %cst_14 = arith.constant 0.000000e+00 : f32
      %15 = vector.broadcast %cst_14 : f32 to vector<1x4xf32>
      %c0_15 = arith.constant 0 : index
      %c0_16 = arith.constant 0 : index
      %16 = vector.load %arg8[%c0_15, %c0_16] : memref<1x4xf32, #tpu.memory_space<vmem>>, vector<1x4xf32>
      tpu.vector_store %arg8[%c0_15, %c0_16], %15 {strides = array<i32>} : memref<1x4xf32, #tpu.memory_space<vmem>>, vector<1x4xf32>,
      %cst_17 = arith.constant 0xFF800000 : f32
      %17 = vector.broadcast %cst_17 : f32 to vector<1x4xf32>
      %c0_18 = arith.constant 0 : index
      %c0_19 = arith.constant 0 : index
      %18 = vector.load %arg9[%c0_18, %c0_19] : memref<1x4xf32, #tpu.memory_space<vmem>>, vector<1x4xf32>
      tpu.vector_store %arg9[%c0_18, %c0_19], %17 {strides = array<i32>} : memref<1x4xf32, #tpu.memory_space<vmem>>, vector<1x4xf32>,
    } else {
    }
    %c0 = arith.constant 0 : index
    %c0_1 = arith.constant 0 : index
    %c0_2 = arith.constant 0 : index
    %3 = vector.load %arg2[%c0, %c0_1, %c0_2] : memref<1x4x256xf32, #tpu.memory_space<vmem>>, vector<1x4x256xf32>
    %c0_3 = arith.constant 0 : index
    %c0_4 = arith.constant 0 : index
    %4 = vector.load %arg8[%c0_3, %c0_4] : memref<1x4xf32, #tpu.memory_space<vmem>>, vector<1x4xf32>
    %cst = arith.constant dense<0.000000e+00> : vector<1x4xf32>
    %5 = vector.multi_reduction <add>, %3, %cst [2] : vector<1x4x256xf32> to vector<1x4xf32>
    %6 = arith.addf %4, %5 : vector<1x4xf32>
    %c0_5 = arith.constant 0 : index
    %c0_6 = arith.constant 0 : index
    %7 = vector.load %arg8[%c0_5, %c0_6] : memref<1x4xf32, #tpu.memory_space<vmem>>, vector<1x4xf32>
    tpu.vector_store %arg8[%c0_5, %c0_6], %6 {strides = array<i32>} : memref<1x4xf32, #tpu.memory_space<vmem>>, vector<1x4xf32>,
    %c0_7 = arith.constant 0 : index
    %c0_8 = arith.constant 0 : index
    %8 = vector.load %arg9[%c0_7, %c0_8] : memref<1x4xf32, #tpu.memory_space<vmem>>, vector<1x4xf32>
    %cst_9 = arith.constant dense<0xFF800000> : vector<1x4xf32>
    %9 = vector.multi_reduction <maximumf>, %3, %cst_9 [2] : vector<1x4x256xf32> to vector<1x4xf32>
    %10 = arith.maximumf %8, %9 : vector<1x4xf32>
    %c0_10 = arith.constant 0 : index
    %c0_11 = arith.constant 0 : index
    %11 = vector.load %arg9[%c0_10, %c0_11] : memref<1x4xf32, #tpu.memory_space<vmem>>, vector<1x4xf32>
    tpu.vector_store %arg9[%c0_10, %c0_11], %10 {strides = array<i32>} : memref<1x4xf32, #tpu.memory_space<vmem>>, vector<1x4xf32>,
    %c0_i32_12 = arith.constant 0 : i32
    %12 = arith.cmpi eq, %arg1, %c0_i32_12 : i32
    %13 = arith.extui %12 : i1 to i32
    %c0_i32_13 = arith.constant 0 : i32
    %14 = arith.cmpi ne, %13, %c0_i32_13 : i32
    scf.if %14 {
      %c0_14 = arith.constant 0 : index
      %c0_15 = arith.constant 0 : index
      %15 = vector.load %arg8[%c0_14, %c0_15] : memref<1x4xf32, #tpu.memory_space<vmem>>, vector<1x4xf32>
      %cst_16 = arith.constant 3.906250e-03 : f32
      %16 = vector.broadcast %cst_16 : f32 to vector<1x4xf32>
      %17 = arith.mulf %15, %16 : vector<1x4xf32>
      %c0_17 = arith.constant 0 : index
      %c0_18 = arith.constant 0 : index
      %18 = vector.load %arg9[%c0_17, %c0_18] : memref<1x4xf32, #tpu.memory_space<vmem>>, vector<1x4xf32>
      %19 = arith.addf %17, %18 : vector<1x4xf32>
      %c0_19 = arith.constant 0 : index
      %c0_20 = arith.constant 0 : index
      %20 = vector.load %arg3[%c0_19, %c0_20] : memref<4x2xf32, #tpu.memory_space<vmem>>, vector<4x2xf32>
      %cst_21 = arith.constant dense<0.000000e+00> : vector<1x2xf32>
      %21 = tpu.matmul %19, %20, %cst_21 {dimension_numbers = #tpu.dot_dimension_numbers<[1], [0], [0], [1], [0, 0, 1, 1], [], []>} : vector<1x4xf32>, vector<4x2xf32>, vector<1x2xf32> -> vector<1x2xf32>
      %c0_22 = arith.constant 0 : index
      %c0_23 = arith.constant 0 : index
      %22 = vector.load %arg4[%c0_22, %c0_23] : memref<1x2xf32, #tpu.memory_space<vmem>>, vector<1x2xf32>
      %23 = arith.addf %21, %22 : vector<1x2xf32>
      %c0_24 = arith.constant 0 : index
      %c0_25 = arith.constant 0 : index
      %24 = vector.load %arg5[%c0_24, %c0_25] : memref<2x4xf32, #tpu.memory_space<vmem>>, vector<2x4xf32>
      %cst_26 = arith.constant dense<0.000000e+00> : vector<1x4xf32>
      %25 = tpu.matmul %23, %24, %cst_26 {dimension_numbers = #tpu.dot_dimension_numbers<[1], [0], [0], [1], [0, 0, 1, 1], [], []>} : vector<1x2xf32>, vector<2x4xf32>, vector<1x4xf32> -> vector<1x4xf32>
      %c0_27 = arith.constant 0 : index
      %c0_28 = arith.constant 0 : index
      %26 = vector.load %arg6[%c0_27, %c0_28] : memref<1x4xf32, #tpu.memory_space<vmem>>, vector<1x4xf32>
      %27 = arith.addf %25, %26 : vector<1x4xf32>
      %28 = arith.negf %27 : vector<1x4xf32>
      %29 = math.exp %28 : vector<1x4xf32>
      %cst_29 = arith.constant 1.000000e+00 : f32
      %30 = vector.broadcast %cst_29 : f32 to vector<1x4xf32>
      %31 = arith.addf %30, %29 : vector<1x4xf32>
      %32 = arith.divf %30, %31 : vector<1x4xf32>
      %c0_30 = arith.constant 0 : index
      %c0_31 = arith.constant 0 : index
      %c0_32 = arith.constant 0 : index
      %33 = vector.load %arg7[%c0_30, %c0_31, %c0_32] : memref<1x1x4xf32, #tpu.memory_space<vmem>>, vector<1x1x4xf32>
      %34 = vector.shape_cast %33 : vector<1x1x4xf32> to vector<1x4xf32>
      %35 = vector.shape_cast %32 : vector<1x4xf32> to vector<1x1x4xf32>
      tpu.vector_store %arg7[%c0_30, %c0_31, %c0_32], %35 {strides = array<i32>} : memref<1x1x4xf32, #tpu.memory_space<vmem>>, vector<1x1x4xf32>,
    } else {
    }
    return
  }
  func.func @transform_0(%arg0: i32, %arg1: i32) -> (i32, i32, i32) {
    %c0_i32 = arith.constant 0 : i32
    %c0_i32_0 = arith.constant 0 : i32
    return %arg0, %c0_i32, %arg1 : i32, i32, i32
  }
  func.func @transform_1(%arg0: i32, %arg1: i32) -> (i32, i32) {
    %c0_i32 = arith.constant 0 : i32
    %c0_i32_0 = arith.constant 0 : i32
    %c0_i32_1 = arith.constant 0 : i32
    return %c0_i32, %c0_i32_0 : i32, i32
  }
  func.func @transform_2(%arg0: i32, %arg1: i32) -> (i32, i32) {
    %c0_i32 = arith.constant 0 : i32
    %c0_i32_0 = arith.constant 0 : i32
    %c0_i32_1 = arith.constant 0 : i32
    return %c0_i32, %c0_i32_0 : i32, i32
  }
  func.func @transform_3(%arg0: i32, %arg1: i32) -> (i32, i32) {
    %c0_i32 = arith.constant 0 : i32
    %c0_i32_0 = arith.constant 0 : i32
    %c0_i32_1 = arith.constant 0 : i32
    return %c0_i32, %c0_i32_0 : i32, i32
  }
  func.func @transform_4(%arg0: i32, %arg1: i32) -> (i32, i32) {
    %c0_i32 = arith.constant 0 : i32
    %c0_i32_0 = arith.constant 0 : i32
    %c0_i32_1 = arith.constant 0 : i32
    return %c0_i32, %c0_i32_0 : i32, i32
  }
  func.func @transform_5(%arg0: i32, %arg1: i32) -> (i32, i32, i32) {
    %c0_i32 = arith.constant 0 : i32
    %c0_i32_0 = arith.constant 0 : i32
    %c0_i32_1 = arith.constant 0 : i32
    return %arg0, %c0_i32, %c0_i32_0 : i32, i32, i32
  }
}

</mosaic_0001>

<bundles_post_ra>
// kernel: tpu_custom_call.1
= control target key start
LH: loop header
LB: loop body
LE: loop exit
PB: predicated region body
PF: predicated region fallthrough
CT: control target
= control target key end

     0   :  { %10 = vsyncpa [#allocation5], 0  ;;  %s1129_s0 = inlined_call_operand.hbm [shape: f32[2,4,256], index: 0, kind: input, shape index: {}]   ;;  %s1130_s1 = inlined_call_operand.vmem [shape: f32[4,2], index: 1, kind: input, shape index: {}]   ;;  %s1131_s2 = inlined_call_operand.vmem [shape: f32[1,2], index: 2, kind: input, shape index: {}]   ;;  %s1132_s3 = inlined_call_operand.vmem [shape: f32[2,4], index: 3, kind: input, shape index: {}]   ;;  %s1133_s4 = inlined_call_operand.vmem [shape: f32[1,4], index: 4, kind: input, shape index: {}]   ;;  %s1134_s5 = inlined_call_operand.hbm [shape: f32[2,1,4], index: 5, kind: output, shape index: {}]  }
   0x1   :  { %12 = vsyncpa [#allocation5 + $0x1], 0 }
   0x2   :  { %13 = vsyncpa [#allocation6], 0 }
   0x3   :  { %15 = vsyncpa [#allocation6 + $0x1], 0  ;;  %s934_s18 = smov 0   ;;  %s936_s19 = smov 0  }
   0x4   :  { %s938_s20 = smov 0   ;;  %s940_s21 = smov 0  }
   0x5   :  { %s942_s22 = smov 0   ;;  %s944_s23 = smov 0  }
   0x6 LB: > { %s677_s24 = sadd.s32 4294967295, %s895_s23   ;;  %s678_s25 = sadd.s32 4294967294, %s895_s23   ;;  %s895_s23 = sphi %s944_s23, %s21_s23   ;;  %s891_s22 = sphi %s942_s22, %s1150_s22   ;;  %s887_s21 = sphi %s940_s21, %s1149_s21   ;;  %s883_s20 = sphi %s938_s20, %s1148_s20   ;;  %s879_s19 = sphi %s936_s19, %s1147_s19   ;;  %s875_s18 = sphi %s934_s18, %s1146_s18  }
   0x7   : > { %s33_s26 = sadd.s32 1, %s891_s22  ;;  %s42_s27 = sadd.s32 1, %s883_s20 }
   0x8   : > { %p35_p0 = scmp.ge.s32.totalorder %s33_s26, 2  ;;  %p49_p1 = scmp.ne.s32.totalorder %s883_s20, %s879_s19 }
   0x9   : > { %p50_p2 = scmp.eq.s32.totalorder %s895_s23, 0  ;;  %p55_p3 = scmp.ne.s32.totalorder %s879_s19, %s875_s18 }
   0xa   : > { %s1152_s26 = smov (%p35_p0, %s33_s26), 0  ;;  %p56_p5 = scmp.eq.s32.totalorder %s677_s24, 0 }
   0xb   : > { %p975_p4 = por %p50_p2, %p49_p1  ;;  %s37_s29 = ssub.s32 %s891_s22, %s1152_s26 }
   0xc   : > { %p163_p6 = scmp.eq.s32.totalorder %s677_s24, 1  ;;  %p40_p7 = scmp.eq.s32.totalorder %s37_s29, 0 }
   0xd   : > { %p981_p8 = por %p56_p5, %p55_p3  ;;  %p169_p10 = scmp.eq.s32.totalorder %s678_s25, 1 }
   0xe   : > { %p985_p9 = por %p163_p6, %p49_p1  ;;  %p721_p13 = scmp.lt.s32.totalorder %s895_s23, 2 }
   0xf   : > { %s990_s7 = scalar_select %p40_p7, %s883_s20, %s42_s27  }
  0x10   : > { %s1138_s6 = scalar_select %p985_p9, 1, 0 }
  0x11   : > { %p992_p11 = por %p169_p10, %p55_p3  ;;  %s201_s9 = sand.u32 1, %s883_s20  }
  0x12   : > { %s681_s10 = sshll.u32 %s201_s9, 3  ;;  %s694_s11 = sshll.u32 %s891_s22, 7 }
  0x13   : > { %s1139_s8 = scalar_select %p992_p11, 1, 0 }
  0x14   : > { %s1003_s14 = scalar_lea.hbm %s1129_s0, %s694_s11  ;;  %s205_s15 = scalar_lea.vmem [#allocation4], %s681_s10 }
  0x15   : > { %s215_s16 = sshll.u32 %s205_s15, 4  ;;  %p1009_p0 = pnand %p721_p13, %p975_p4  ;;  %s1005_s16 = int_to_ptr.vmem [resolvable:$true] %s215_s16 }
  0x16   : > { %s202_s24 = scalar_lea.sflag [#allocation5], %s201_s9  ;;  %s783_s25 = scalar_lea.hbm %s1003_s14, 128 }
  0x17   : > { %p784_p3 = scmp.ne.s32.totalorder %s1003_s14, %s783_s25  ;;  %p785_p5 = pneg %p1009_p0 }
  0x18   : > { %s788_s28 = scalar_lea.hbm %s1129_s0, 256  ;;  %p789_p4 = scmp.lt.u32.totalorder %s1003_s14, %s1129_s0 }
  0x19   : > { %p786_p6 = pnand %p785_p5, %p784_p3  ;;  %p790_p10 = scmp.lt.u32.totalorder %s788_s28, %s783_s25 }
  0x1a   : > { %p792_p12 = scmp.lt.u32.totalorder %s783_s25, %s1003_s14 }
  0x1b   : > { %p787_p7 = pneg %p786_p6  ;;  %p791_p13 = por %p790_p10, %p789_p4 }
  0x1d   : > { %p793_p1 = por %p792_p12, %p791_p13 }
  0x1f   : > { %p794_p2 = pnand %p793_p1, %p787_p7 }
  0x21   : > { %797 = shalt.err (!%p794_p2)
}
  0x22   : > { %s798_s9 = scalar_lea.vmem %s1005_s16, 128  ;;  %s897_s12 = smov [#allocation4]  }
  0x23   : > { %p799_p3 = scmp.ne.s32.totalorder %s1005_s16, %s798_s9  ;;  %s803_s13 = sshll.u32 %s897_s12, 4  ;;  %s804_s13 = int_to_ptr.vmem [resolvable:$false] %s803_s13 }
  0x24   : > { %s805_s15 = scalar_lea.vmem %s804_s13, 256  ;;  %p806_p9 = scmp.lt.s32.totalorder %s1005_s16, %s804_s13 }
  0x25   : > { %p801_p6 = pnand %p799_p3, %p785_p5  ;;  %p807_p4 = scmp.lt.s32.totalorder %s805_s15, %s798_s9 }
  0x27   : > { %p802_p11 = pneg %p801_p6  ;;  %p808_p10 = por %p807_p4, %p806_p9 }
  0x29   : > { %p809_p12 = pnand %p808_p10, %p802_p11 }
  0x2b   : > { %812 = shalt.err (!%p809_p12)
}
  0x2c   : > { %716 = dma.hbm_to_vmem [thread:$0]  (!%p1009_p0), %s1003_s14, 128, %s1005_s16, %s202_s24  }
  0x2d   : > { %p1141_p1 = scmp.lt.s32.totalorder %s895_s23, 3  ;;  %p1142_p2 = scmp.ge.s32.totalorder %s895_s23, 1 }
  0x2f   : > { %p221_p5 = pnand %p1142_p2, %p1141_p1 }
  0x30   : > { %s1045_s25 = sand.u32 (!%p221_p5), 1, %s879_s19  }
  0x31   : > { %224 = sbr.rel (%p221_p5) target bundleno = 834 (0x342), region = 40  ;;  %s685_s27 = sshll.u32 (!%p221_p5), %s1045_s25, 3 }
  0x32   : > { %s227_s29 = scalar_lea.sflag (!%p221_p5), [#allocation5], %s1045_s25  ;;  %s230_s28 = scalar_lea.vmem (!%p221_p5), [#allocation4], %s685_s27 }
  0x38   : > { %866 = dma.done.wait (%p981_p8), %s227_s29, 128  }
  0x39   : > { %868 = vsyncadd (%p981_p8), %s227_s29, 4294967168  ;;  %vm269_vm0 = vcmask 1043456   ;;  %v264_v0 = vld [vmem:[%s230_s28] sm:$0xff]  ;;  %v898_v8 = vmov 0   ;;  %v276_v9 = vlaneseq  ;;  %v899_v13 = vmov 1966171168  }
  0x3a   : > { %v267_v1 = vcombine.high %v264_v0, %v264_v0  ;;  %v270_v2 = vsel %vm269_vm0, %v264_v0, 0.0  ;;  %v344_v4 = vsel %vm269_vm0, %v264_v0, -inf  ;;  %776 = vset.pattern.permute.xlu1 %v898_v8  ;;  %777 = vset.pattern.permute.xlu0 %v898_v8  ;;  %v295_v14 = vunpack.c.l.s4 %v899_v13  ;;  %v421_v45 = vld [vmem:[%s1130_s1] sm:$0xf]  ;;  %s691_s12 = sshll.u32 %s887_s21, 4  ;;  %s255_s13 = scalar_lea.vmem [#allocation7], %s1045_s25 }
  0x3b   : > { %v277_v10 = vshrl.u32 %v276_v9, 7  ;;  %v320_v11 = vand.u32 127, %v276_v9  ;;  %vm261_vm1 = vcmask 24576   ;;  %v900_v41 = vmov 0.0   ;;  %v500_v62 = vld [vmem:[%s1132_s3] sm:$0x3]  ;;  %s1079_s28 = scalar_lea.hbm %s1134_s5, %s691_s12 }
  0x3c   : > { %v271_v3 = vsel %vm269_vm0, %v267_v1, 0.0  ;;  %v345_v5 = vsel %vm269_vm0, %v267_v1, -inf  ;;  %v296_v19 = vunpack.c.0.s8 %v295_v14  ;;  %262 = vst.msk [vmem:[#allocation2] sm:$0x1] %vm261_vm1, %v900_v41  ;;  %699 = vmatprep.subr.mxu0 %v900_v41  ;;  %704 = vmatprep.subr.mxu1 %v900_v41  ;;  %v901_v44 = vmov -inf   ;;  %s600_s15 = sshll.u32 %s255_s13, 4  ;;  %s1081_s15 = int_to_ptr.vmem [resolvable:$true] %s600_s15 }
  0x3d   : > { %v272_v6 = vadd.f32 %v271_v3, %v270_v2  ;;  %v346_v7 = vmax.f32 %v344_v4, %v345_v5  ;;  %v323_v12 = vsub.s32 %v320_v11, %v277_v10  ;;  %v278_v15 = vsub.s32 0, %v277_v10  ;;  %263 = vst.msk [vmem:[#allocation3] sm:$0x1] %vm261_vm1, %v901_v44  ;;  %700 = vmatpush3.msk.msra.mxu0 %vm269_vm0, %v421_v45  ;;  %v422_v63 = vld [vmem:[%s1131_s2] sm:$0x1]  ;;  %s588_s30 = scalar_lea.sflag [#allocation6], %s1045_s25 }
  0x3e   : > { %v282_v16 = vsub.s32 1, %v277_v10  ;;  %v286_v17 = vsub.s32 2, %v277_v10  ;;  %v290_v18 = vsub.s32 3, %v277_v10  ;;  %v299_v25 = vsub.s32 %v296_v19, %v277_v10  ;;  %v501_v3 = vld [vmem:[%s1133_s4] sm:$0x1]  ;;  %s813_s14 = scalar_lea.vmem %s1081_s15, 16 }
  0x3f   : > { %273 = vadd.xlane.f32.xlu0 %v272_v6  ;;  %vm902_vm2 = vmmov 0   ;;  %vm423_vm3 = vcmask 31744   ;;  %vm506_vm4 = vcmask 1041408   ;;  %vm502_vm5 = vcmask 15360   ;;  %p814_p8 = scmp.ne.s32.totalorder %s1081_s15, %s813_s14  ;;  %p1143_p9 = scmp.ne.s32.totalorder %s1138_s6, 0 }
  0x40   : > { %701 = vmatprep.mubr.msk.f32.mxu0 %vm902_vm2, %v900_v41  ;;  %706 = vmatprep.mubr.msk.f32.mxu1 %vm902_vm2, %v900_v41  ;;  %s903_s21 = smov [#allocation7]  }
  0x41   : > { %705 = vmatpush3.msk.msra.mxu1 %vm506_vm4, %v500_v62  ;;  %p815_p11 = pnand %p814_p8, %p1143_p9  ;;  %s817_s16 = sshll.u32 %s903_s21, 4  ;;  %s818_s16 = int_to_ptr.vmem [resolvable:$false] %s817_s16 }
  0x42   : > { %s819_s17 = scalar_lea.vmem %s818_s16, 32  ;;  %p820_p7 = scmp.lt.s32.totalorder %s1081_s15, %s818_s16 }
  0x43   : > { %347 = vmax.xlane.f32.xlu0 %v346_v7  ;;  %v265_v50 = vld [vmem:[#allocation2] sm:$0x1]  ;;  %p816_p0 = pneg %p815_p11  ;;  %p821_p13 = scmp.lt.s32.totalorder %s819_s17, %s813_s14 }
  0x44   : > { %v343_v55 = vld [vmem:[#allocation3] sm:$0x1] }
  0x45   : > { %p822_p3 = por %p821_p13, %p820_p7 }
  0x47   : > { %p823_p6 = pnand %p822_p3, %p816_p0 }
  0xcc   : > { %v274_v20 = vpop.xlane.xlu0 %273 }
  0xcd   : > { %v279_v21 = vrot.slane %v274_v20, %v278_v15  ;;  %v283_v22 = vrot.slane %v274_v20, %v282_v16  ;;  %v287_v23 = vrot.slane %v274_v20, %v286_v17  ;;  %v291_v24 = vrot.slane %v274_v20, %v290_v18 }
  0xcf   : > { %v292_v26 = vcombine.low %v279_v21, %v283_v22  ;;  %v293_v27 = vcombine.low %v287_v23, %v291_v24 }
  0xd0   : > { %v348_v28 = vpop.xlane.xlu0 %347 }
  0xd1   : > { %v353_v29 = vrot.slane %v348_v28, %v278_v15  ;;  %v357_v30 = vrot.slane %v348_v28, %v282_v16  ;;  %v361_v31 = vrot.slane %v348_v28, %v286_v17  ;;  %v365_v32 = vrot.slane %v348_v28, %v290_v18 }
  0xd2   : > { %v300_v33 = vrot.slane %v292_v26, %v299_v25  ;;  %v307_v34 = vrot.slane %v293_v27, %v299_v25 }
  0xd3   : > { %v366_v35 = vcombine.low %v353_v29, %v357_v30  ;;  %v367_v36 = vcombine.low %v361_v31, %v365_v32 }
  0xd4   : > { %v308_v37 = vcombine.low %v300_v33, %v307_v34 }
  0xd5   : > { %v374_v38 = vrot.slane %v366_v35, %v299_v25  ;;  %v381_v39 = vrot.slane %v367_v36, %v299_v25 }
  0xd6   : > { %v315_v40 = vrot.slane %v308_v37, %v299_v25 }
  0xd7   : > { %v382_v42 = vcombine.low %v374_v38, %v381_v39 }
  0xd8   : > { %317 = vperm.xlu1 %776, %v315_v40  }
  0xd9   : > { %v389_v43 = vrot.slane %v382_v42, %v299_v25 }
  0xdc   : > { %391 = vperm.xlu1 %776, %v389_v43  }
 0x157   : > { %v318_v46 = vpop.permute.xlu1 %317 }
 0x158   : > { %v324_v47 = vrot.slane %v318_v46, %v323_v12 }
 0x15a   : > { %v331_v48 = vrot.slane %v324_v47, %v299_v25 }
 0x15b   : > { %v392_v49 = vpop.permute.xlu1 %391 }
 0x15c   : > { %v338_v51 = vrot.slane %v331_v48, %v299_v25  ;;  %v396_v52 = vrot.slane %v392_v49, %v323_v12 }
 0x15e   : > { %v403_v53 = vrot.slane %v396_v52, %v299_v25  ;;  %v340_v54 = vadd.f32 %v338_v51, %v265_v50 }
 0x160   : > { %v410_v56 = vrot.slane %v403_v53, %v299_v25  ;;  %342 = vst.msk [vmem:[#allocation2] sm:$0x1] %vm261_vm1, %v340_v54 }
 0x162   : > { %v412_v57 = vmax.f32 %v343_v55, %v410_v56 }
 0x164   : > { %413 = vst.msk [vmem:[#allocation3] sm:$0x1] %vm261_vm1, %v412_v57 }
 0x167   : > { %v417_v58 = vld [vmem:[#allocation2] sm:$0x1] }
 0x168   : > { %v418_v59 = vmul.f32 0.00390625, %v417_v58 }
 0x16b   : > { %v419_v60 = vld [vmem:[#allocation3] sm:$0x1] }
 0x16c   : > { %v420_v61 = vadd.f32 %v419_v60, %v418_v59 }
 0x16e   : > { %702 = vmatmul.mubr.msk.f32.vlgmr.msra.gmra.mrb[0].mxu0 %vm423_vm3, %v420_v61 }
 0x241   : > { %v496_v0 = vpop.f32.mrb[0].mxu0 }
 0x242   : > { %v497_v1 = vadd.f32 %v496_v0, %v422_v63  ;;  %v703_v2 = vpop.f32.mrb[1].mxu0 }
 0x244   : > { %707 = vmatmul.mubr.msk.f32.vlgmr.msra.gmra.mrb[0].mxu1 %vm502_vm5, %v497_v1 }
 0x317   : > { %v576_v4 = vpop.f32.mrb[0].mxu1 }
 0x318   : > { %v577_v5 = vadd.f32 %v576_v4, %v501_v3  ;;  %v708_v6 = vpop.f32.mrb[1].mxu1 }
 0x31a   : > { %v690_v7 = vmul.f32 -1.442695, %v577_v5 }
 0x31c   : > { %779 = vpow2.f32 %v690_v7 }
 0x326   : > { %v780_v8 = vpop.eup %779 }
 0x327   : > { %v583_v9 = vadd.f32 1.0, %v780_v8 }
 0x329   : > { %781 = vrcp.f32 %v583_v9 }
 0x333   : > { %v782_v10 = vpop.eup %781 }
 0x334   : > { %586 = vst.msk [vmem:[%s255_s13] sm:$0x1] %vm261_vm1, %v782_v10 }
 0x335   : > { %826 = shalt.err (!%p823_p6)
}
 0x336   : > { %s827_s25 = scalar_lea.hbm %s1079_s28, 16  ;;  %s831_s11 = scalar_lea.hbm %s1134_s5, 32 }
 0x337   : > { %p828_p4 = scmp.ne.s32.totalorder %s1079_s28, %s827_s25  ;;  %p832_p1 = scmp.lt.u32.totalorder %s1079_s28, %s1134_s5 }
 0x338   : > { %p833_p2 = scmp.lt.u32.totalorder %s831_s11, %s827_s25  ;;  %p835_p8 = scmp.lt.u32.totalorder %s827_s25, %s1079_s28 }
 0x339   : > { %p829_p10 = pnand %p828_p4, %p1143_p9 }
 0x33a   : > { %p834_p5 = por %p833_p2, %p832_p1 }
 0x33b   : > { %p830_p12 = pneg %p829_p10 }
 0x33c   : > { %p836_p11 = por %p835_p8, %p834_p5 }
 0x33e   : > { %p837_p0 = pnand %p836_p11, %p830_p12 }
 0x340   : > { %840 = shalt.err (!%p837_p0)
}
 0x341   : > { %711 = dma.vmem_to_hbm [thread:$0]  (%p1143_p9), %s1081_s15, 16, %s1079_s28, %s588_s30  }
 0x342 PF: > { %s612_s13 = sand.u32 1, %s875_s18   ;;  %p1144_p7 = scmp.ne.s32.totalorder %s1139_s8, 0 }
 0x343   : > { %p1145_p13 = scmp.ge.s32.totalorder %s895_s23, 2  ;;  %s613_s27 = scalar_lea.sflag [#allocation6], %s612_s13 }
 0x345   : > { %p718_p3 = pnand %p1145_p13, %p1144_p7 }
 0x347   : > { %870 = dma.done.wait (!%p718_p3), %s613_s27, 16  }
 0x348   : > { %872 = vsyncadd (!%p718_p3), %s613_s27, 4294967280  ;;  %s21_s23 = sadd.s32 1, %s895_s23   ;;  %s1146_s18 = smov %s879_s19 }
 0x349   : > { %p18_p6 = scmp.ge.s32.totalorder %s21_s23, 4   ;;  %s1147_s19 = smov %s883_s20 }
 0x34a   : > { %s1148_s20 = smov %s990_s7  ;;  %s1149_s21 = smov %s891_s22 }
 0x34b   : > { %s1150_s22 = smov %s1152_s26  ;;  %20 = sbr.rel (!%p18_p6) target bundleno = 6 (0x6), region = 93 }
 0x352   :  { %617 = vsyncpa [#allocation5], 1 }
 0x353   :  { %619 = vsyncpa [#allocation5 + $0x1], 1 }
 0x354   :  { %620 = vsyncpa [#allocation6], 1 }
 0x355   :  { %622 = vsyncpa [#allocation6 + $0x1], 1 }

</bundles_post_ra>
